<compile_context>
chip_gen: v6e
topology: v6e:2x2x1
jax: 0.10.0
libtpu: 0.0.40
codegen_flags: <defaults>
</compile_context>

<pallas_src>
import functools
import jax
import jax.numpy as jnp
from jax.experimental import pallas as pl
from jax.experimental.pallas import tpu as pltpu


# --------------------------- hardware configuration --------------------------
@functools.lru_cache(maxsize=1)
def _hw_config():
    """Generation-dependent knobs: VMEM budget, core count, SiLU dtype."""
    gen = 6
    try:
        kind = jax.devices()[0].device_kind.lower()
        if "v7" in kind:
            gen = 7
        elif "v6" in kind:
            gen = 6
        elif "v5" in kind:
            gen = 5
        elif "v4" in kind:
            gen = 4
    except Exception:
        pass
    if gen >= 7:
        # 64 MiB physical VMEM per TensorCore, 2 TCs/chip, bf16 VPU/EUP.
        return {"vmem_limit": 32 << 20, "vmem_budget": 24 << 20,
                "num_cores": 2, "silu_bf16": True}
    if gen == 6:
        # 128 MiB VMEM, 1 TC, bf16 VPU/EUP.
        return {"vmem_limit": 64 << 20, "vmem_budget": 48 << 20,
                "num_cores": 1, "silu_bf16": True}
    # v5e / older / unknown: 128 MiB VMEM, f32-only VPU/EUP.
    return {"vmem_limit": 64 << 20, "vmem_budget": 48 << 20,
            "num_cores": 1, "silu_bf16": False}


# ----------------------------- Pallas kernels --------------------------------
def _apply_model_kernel_ctrl(x_ref, bias_ref, ctrl_ref,
                             w_in_t_ref, w_out_t_ref, b_out_ref, out_ref,
                             *, silu_bf16):
    """One grid step = (batch b, spatial tile t). Channels-first layout.

    x_ref     : (1, Cin, T)   f32  NCHW slab (spatial tile on the lane axis)
    bias_ref  : (1, Hhid, 1)  f32  per-batch (emb + b_in), broadcast over HW
    ctrl_ref  : (1, Cout, T)  f32  control residual tile (added in f32)
    w_in_t_ref: (Hhid, Cin)   bf16 1x1 conv #1 weight, transposed
    w_out_t_ref:(Cout, Hhid)  bf16 1x1 conv #2 weight, transposed
    b_out_ref : (Cout, 1)     f32
    out_ref   : (1, Cout, T)  bf16
    """
    x = x_ref[0].astype(jnp.bfloat16)                               # cast in-kernel
    h = jnp.dot(w_in_t_ref[...], x, preferred_element_type=jnp.float32)
    h = h + bias_ref[0]                                             # (Hhid,1) bcast
    if silu_bf16:                                                   # v6e/v7x
        hb = h.astype(jnp.bfloat16)
        hb = hb * jax.nn.sigmoid(hb)
    else:                                                           # v5e: f32 SiLU
        h = h * jax.nn.sigmoid(h)
        hb = h.astype(jnp.bfloat16)
    o = jnp.dot(w_out_t_ref[...], hb, preferred_element_type=jnp.float32)
    o = o + b_out_ref[...] + ctrl_ref[0]                            # ctrl in f32
    out_ref[0] = o.astype(out_ref.dtype)                            # bf16 writeback


def _apply_model_kernel_noctrl(x_ref, bias_ref,
                               w_in_t_ref, w_out_t_ref, b_out_ref, out_ref,
                               *, silu_bf16):
    x = x_ref[0].astype(jnp.bfloat16)
    h = jnp.dot(w_in_t_ref[...], x, preferred_element_type=jnp.float32)
    h = h + bias_ref[0]
    if silu_bf16:
        hb = h.astype(jnp.bfloat16)
        hb = hb * jax.nn.sigmoid(hb)
    else:
        h = h * jax.nn.sigmoid(h)
        hb = h.astype(jnp.bfloat16)
    o = jnp.dot(w_out_t_ref[...], hb, preferred_element_type=jnp.float32)
    o = o + b_out_ref[...]
    out_ref[0] = o.astype(out_ref.dtype)


def _pick_hw_tile(hw, *, per_col_bytes, fixed_bytes, vmem_budget,
                  min_total_blocks, batch, soft_cap=2048):
    """Largest multiple-of-128 divisor of HW that fits the VMEM budget and
    (only where it matters, i.e. v7x megacore) leaves enough blocks so every
    TensorCore gets work.  Single-TC parts get the fewest, biggest tiles."""
    if hw % 128 != 0:
        # TODO(synk): pad HW up to a multiple of 128 for large unaligned shapes
        # instead of falling back to one full-HW block.
        return hw
    max_by_vmem = max(128, (vmem_budget - fixed_bytes) // max(per_col_bytes, 1))
    cap = min(max_by_vmem, soft_cap)
    need_nt = max(1, -(-min_total_blocks // max(batch, 1)))   # ceil div
    best = 128
    t = 128
    while t <= hw:
        if hw % t == 0 and t <= cap and hw // t >= need_nt:
            best = t
        t += 128
    return best


def _fused_apply_model(x_cf, bias, ctrl_cf, w_in_t, w_out_t, b_out_col, cfg):
    """x_cf: (B, Cin, HW) f32 (native); bias: (B, Hhid, 1) f32;
    ctrl_cf: (B, Cout, HW) f32 or None; w_in_t: (Hhid, Cin) bf16;
    w_out_t: (Cout, Hhid) bf16; b_out_col: (Cout, 1) f32.
    Returns (B, Cout, HW) bf16 (NCHW-flattened)."""
    B, Cin, HW = x_cf.shape
    Hhid = w_in_t.shape[0]
    Cout = w_out_t.shape[0]
    has_ctrl = ctrl_cf is not None

    # VMEM bytes per spatial column: double-buffered I/O slabs + the in-kernel
    # h intermediate (f32 + bf16 copy) + the f32 o intermediate.
    per_col = (2 * Cin * x_cf.dtype.itemsize        # x block (double-buffered)
               + 2 * Cout * 2                       # bf16 out block (double-buffered)
               + Hhid * (4 + 2)                     # h f32 + its bf16 cast
               + Cout * 4)                          # o f32 before cast
    if has_ctrl:
        per_col += 2 * Cout * ctrl_cf.dtype.itemsize
    fixed = (Hhid * Cin * 2 + Cout * Hhid * 2 + Cout * 4
             + 2 * Hhid * 4 + (1 << 20))            # weights + bias block + slack
    # TODO(synk): for very large hidden dims, chunk Hhid inside the kernel
    # (fori_loop over 256-wide slices accumulating into a (Cout, tile) f32
    # scratch) to drop the Hhid*tile*6B intermediate entirely.
    tile = _pick_hw_tile(HW, per_col_bytes=per_col, fixed_bytes=fixed,
                         vmem_budget=cfg["vmem_budget"],
                         min_total_blocks=cfg["num_cores"], batch=B)
    nt = HW // tile

    x_spec = pl.BlockSpec((1, Cin, tile), lambda b, t: (b, 0, t))
    bias_spec = pl.BlockSpec((1, Hhid, 1), lambda b, t: (b, 0, 0))
    w_in_spec = pl.BlockSpec((Hhid, Cin), lambda b, t: (0, 0))
    w_out_spec = pl.BlockSpec((Cout, Hhid), lambda b, t: (0, 0))
    b_out_spec = pl.BlockSpec((Cout, 1), lambda b, t: (0, 0))
    out_spec = pl.BlockSpec((1, Cout, tile), lambda b, t: (b, 0, t))

    if has_ctrl:
        kernel = functools.partial(_apply_model_kernel_ctrl,
                                   silu_bf16=cfg["silu_bf16"])
        ctrl_spec = pl.BlockSpec((1, Cout, tile), lambda b, t: (b, 0, t))
        in_specs = [x_spec, bias_spec, ctrl_spec, w_in_spec, w_out_spec, b_out_spec]
        args = (x_cf, bias, ctrl_cf, w_in_t, w_out_t, b_out_col)
    else:
        kernel = functools.partial(_apply_model_kernel_noctrl,
                                   silu_bf16=cfg["silu_bf16"])
        in_specs = [x_spec, bias_spec, w_in_spec, w_out_spec, b_out_spec]
        args = (x_cf, bias, w_in_t, w_out_t, b_out_col)

    flops = 2 * B * HW * (Cin * Hhid + Hhid * Cout)
    bytes_accessed = (x_cf.size * x_cf.dtype.itemsize + bias.size * 4
                      + w_in_t.size * 2 + w_out_t.size * 2 + b_out_col.size * 4
                      + B * Cout * HW * 2)          # bf16 output writeback
    if has_ctrl:
        bytes_accessed += ctrl_cf.size * ctrl_cf.dtype.itemsize

    # TODO(synk): padding Cout/Cin up to full sublane groups would turn the
    # narrow-channel loads/stores into unmasked full-sublane accesses, but the
    # wrapper-side pad/slice ops cost more HBM traffic than they save at these
    # channel widths, so it is intentionally not done here.
    return pl.pallas_call(
        kernel,
        out_shape=jax.ShapeDtypeStruct((B, Cout, HW), jnp.bfloat16),
        grid_spec=pl.GridSpec(grid=(B, nt), in_specs=in_specs, out_specs=out_spec),
        compiler_params=pltpu.CompilerParams(
            dimension_semantics=("parallel", "parallel"),
            vmem_limit_bytes=cfg["vmem_limit"]),
        cost_estimate=pl.CostEstimate(flops=flops,
                                      transcendentals=B * HW * Hhid,
                                      bytes_accessed=bytes_accessed),
    )(*args)


# ------------------------- synthetic apply-model `func` ----------------------
def _timestep_embedding(t, dim, max_period=10000.0):
    half = dim // 2
    freqs = jnp.exp(
        -jnp.log(jnp.float32(max_period))
        * jnp.arange(half, dtype=jnp.float32) / half)
    args = t.astype(jnp.float32)[:, None] * freqs[None, :]
    return jnp.concatenate([jnp.cos(args), jnp.sin(args)], axis=-1)   # (B, dim)


def make_params(key, c_in, hidden, c_out, ctx_dim, y_dim):
    ks = jax.random.split(key, 8)
    s = lambda k, shp, fan: (jax.random.normal(k, shp, jnp.float32)
                             / jnp.sqrt(jnp.float32(fan)))
    return dict(
        w_t=s(ks[0], (hidden, hidden), hidden),
        b_t=jnp.zeros((hidden,), jnp.float32),
        w_y=s(ks[1], (y_dim, hidden), y_dim),
        w_c=s(ks[2], (ctx_dim, hidden), ctx_dim),
        w_in=s(ks[3], (c_in, hidden), c_in),
        b_in=jnp.zeros((1, hidden), jnp.float32),
        w_out=s(ks[4], (hidden, c_out), hidden),
        b_out=jnp.zeros((1, c_out), jnp.float32),
    )


def prepare_apply_model_params(params):
    """Hoist constant weight transforms (transpose + bf16 cast + bias reshape)
    out of the per-step hot path; reuse across all sampler steps."""
    prep = dict(params)
    prep["w_in_t_bf16"] = jnp.asarray(params["w_in"].T, jnp.bfloat16)
    prep["w_out_t_bf16"] = jnp.asarray(params["w_out"].T, jnp.bfloat16)
    prep["b_out_col"] = params["b_out"].reshape(-1, 1).astype(jnp.float32)
    return prep


def synthetic_apply_model(prep, input_x, timestep, *, c_concat=None,
                          c_crossattn=None, control=None,
                          transformer_options=None, y=None):
    """The wrapped `func`. input_x / c_concat / control are NCHW (native f32)."""
    B, C, Hs, Ws = input_x.shape
    hidden = prep["w_in"].shape[1]
    c_out = prep["w_out"].shape[1]
    HW = Hs * Ws

    # channel concat (apply_model semantics when c_concat is given)
    x = input_x if c_concat is None else jnp.concatenate([input_x, c_concat], axis=1)

    # small embedding glue (plain JAX): timestep MLP + class + pooled context
    t_emb = _timestep_embedding(timestep, hidden)                    # (B, hidden)
    emb = jax.nn.silu(t_emb @ prep["w_t"] + prep["b_t"])
    if y is not None:
        emb = emb + y @ prep["w_y"]
    if c_crossattn is not None:
        emb = emb + jnp.mean(c_crossattn, axis=1) @ prep["w_c"]

    # channels-first (B, C, HW) views in the NATIVE dtype — NCHW needs no
    # transpose, and the bf16 cast for the MXU happens inside the kernel.
    x_cf = x.reshape(B, -1, HW)
    ctrl_cf = None if control is None else control.reshape(B, c_out, HW)

    # fold b_in into the per-batch bias once: (B, hidden, 1) f32
    bias = (emb + prep["b_in"]).astype(jnp.float32)[..., None]

    out_cf = _fused_apply_model(x_cf, bias, ctrl_cf,
                                prep["w_in_t_bf16"], prep["w_out_t_bf16"],
                                prep["b_out_col"], _hw_config())

    return out_cf.reshape(B, c_out, Hs, Ws)        # NCHW, bf16


# ------------------- BaseModelApplyModelModule equivalent --------------------
class BaseModelApplyModelModule:
    """Mirrors the PyTorch wrapper: stores `func`, forwards all args to it,
    replacing transformer_options with a fresh empty dict."""

    def __init__(self, func, module=None):
        self.func = func
        self.module = module

    def __call__(self, input_x, timestep, c_concat=None, c_crossattn=None,
                 y=None, control=None, transformer_options=None):
        kwargs = {"y": y}
        new_transformer_options = {}
        return self.func(input_x, timestep, c_concat=c_concat,
                         c_crossattn=c_crossattn, control=control,
                         transformer_options=new_transformer_options, **kwargs)


# ------------------------------ reference ------------------------------------
def _reference(prep, input_x, timestep, c_concat, c_crossattn, y, control, cfg):
    """Pure-JAX reference mirroring the kernel's bf16-MXU / f32-accumulate math."""
    B, C, Hs, Ws = input_x.shape
    hidden = prep["w_in"].shape[1]
    c_out = prep["w_out"].shape[1]
    x = input_x if c_concat is None else jnp.concatenate([input_x, c_concat], axis=1)
    t_emb = _timestep_embedding(timestep, hidden)
    emb = jax.nn.silu(t_emb @ prep["w_t"] + prep["b_t"])
    if y is not None:
        emb = emb + y @ prep["w_y"]
    if c_crossattn is not None:
        emb = emb + jnp.mean(c_crossattn, axis=1) @ prep["w_c"]
    x_flat = jnp.transpose(x, (0, 2, 3, 1)).reshape(B, Hs * Ws, -1)
    h = jnp.einsum("bqc,ch->bqh", x_flat.astype(jnp.bfloat16),
                   prep["w_in"].astype(jnp.bfloat16),
                   preferred_element_type=jnp.float32)
    h = h + (emb + prep["b_in"])[:, None, :]
    if cfg["silu_bf16"]:
        hb = h.astype(jnp.bfloat16)
        hb = hb * jax.nn.sigmoid(hb)
    else:
        hb = (h * jax.nn.sigmoid(h)).astype(jnp.bfloat16)
    o = jnp.einsum("bqh,ho->bqo", hb, prep["w_out"].astype(jnp.bfloat16),
                   preferred_element_type=jnp.float32)
    o = o + prep["b_out"]
    if control is not None:
        o = o + jnp.transpose(control, (0, 2, 3, 1)).reshape(B, Hs * Ws, c_out)
    o = o.astype(jnp.bfloat16)
    return jnp.transpose(o.reshape(B, Hs, Ws, c_out), (0, 3, 1, 2))


if __name__ == "__main__":
    B, C, Hs, Ws = 2, 4, 16, 16
    Cc = 4                 # c_concat channels
    HIDDEN = 32
    L, CTX = 8, 32         # cross-attn context
    YDIM = 16
    COUT = C

    key = jax.random.PRNGKey(0)
    kx, kc, kctx, ky, kctrl, kt, kp = jax.random.split(key, 7)

    input_x = jax.random.normal(kx, (B, C, Hs, Ws), jnp.float32)
    c_concat = jax.random.normal(kc, (B, Cc, Hs, Ws), jnp.float32)
    c_crossattn = jax.random.normal(kctx, (B, L, CTX), jnp.float32)
    y = jax.random.normal(ky, (B, YDIM), jnp.float32)
    control = jax.random.normal(kctrl, (B, COUT, Hs, Ws), jnp.float32)
    timestep = jax.random.uniform(kt, (B,), jnp.float32, 0.0, 999.0)

    params = make_params(kp, c_in=C + Cc, hidden=HIDDEN, c_out=COUT,
                         ctx_dim=CTX, y_dim=YDIM)
    prepared = prepare_apply_model_params(params)   # hoisted weight prep
    cfg = _hw_config()

    func = functools.partial(synthetic_apply_model, prepared)
    model = BaseModelApplyModelModule(func, module=None)

    # with control residual
    out = model(input_x, timestep, c_concat=c_concat, c_crossattn=c_crossattn,
                y=y, control=control, transformer_options={"junk": 1})
    out = jax.block_until_ready(out)
    ref = _reference(prepared, input_x, timestep, c_concat, c_crossattn, y,
                     control, cfg)
    assert out.shape == (B, COUT, Hs, Ws)
    assert out.dtype == jnp.bfloat16
    assert jnp.allclose(out.astype(jnp.float32), ref.astype(jnp.float32),
                        atol=5e-2, rtol=5e-2)

    # without control (statically elided residual path)
    out_nc = model(input_x, timestep, c_concat=c_concat, c_crossattn=c_crossattn,
                   y=y, control=None, transformer_options={})
    out_nc = jax.block_until_ready(out_nc)
    ref_nc = _reference(prepared, input_x, timestep, c_concat, c_crossattn, y,
                        None, cfg)
    assert out_nc.shape == (B, COUT, Hs, Ws)
    assert jnp.allclose(out_nc.astype(jnp.float32), ref_nc.astype(jnp.float32),
                        atol=5e-2, rtol=5e-2)

    print("KERNEL_OK")
</pallas_src>

<mosaic_0001>
module attributes {stable_mosaic.version = 11 : i64} {
  func.func @_apply_model_kernel_ctrl(%arg0: i32, %arg1: i32, %arg2: memref<1x8x256xf32, #tpu.memory_space<vmem>>, %arg3: memref<1x32x1xf32, #tpu.memory_space<vmem>>, %arg4: memref<1x4x256xf32, #tpu.memory_space<vmem>>, %arg5: memref<32x8xbf16, #tpu.memory_space<vmem>>, %arg6: memref<4x32xbf16, #tpu.memory_space<vmem>>, %arg7: memref<4x1xf32, #tpu.memory_space<vmem>>, %arg8: memref<1x4x256xbf16, #tpu.memory_space<vmem>>) attributes {dimension_semantics = [#tpu.dimension_semantics<parallel>, #tpu.dimension_semantics<parallel>], iteration_bounds = array<i64: 2, 1>, scalar_prefetch = 0 : i64, scratch_operands = 0 : i64, tpu.core_type = #tpu.core_type<tc>, window_params = [{transform_indices = @transform_0, window_bounds = array<i64: 1, 8, 256>}, {transform_indices = @transform_1, window_bounds = array<i64: 1, 32, 1>}, {transform_indices = @transform_2, window_bounds = array<i64: 1, 4, 256>}, {pipeline_mode = #tpu.pipeline_mode<synchronous>, transform_indices = @transform_3, window_bounds = array<i64: 32, 8>}, {pipeline_mode = #tpu.pipeline_mode<synchronous>, transform_indices = @transform_4, window_bounds = array<i64: 4, 32>}, {pipeline_mode = #tpu.pipeline_mode<synchronous>, transform_indices = @transform_5, window_bounds = array<i64: 4, 1>}, {transform_indices = @transform_6, window_bounds = array<i64: 1, 4, 256>}]} {
    %c0 = arith.constant 0 : index
    %c0_0 = arith.constant 0 : index
    %c0_1 = arith.constant 0 : index
    %0 = vector.load %arg2[%c0, %c0_0, %c0_1] : memref<1x8x256xf32, #tpu.memory_space<vmem>>, vector<1x8x256xf32>
    %1 = vector.shape_cast %0 : vector<1x8x256xf32> to vector<8x256xf32>
    %2 = arith.truncf %1 : vector<8x256xf32> to vector<8x256xbf16>
    %c0_2 = arith.constant 0 : index
    %c0_3 = arith.constant 0 : index
    %3 = vector.load %arg5[%c0_2, %c0_3] : memref<32x8xbf16, #tpu.memory_space<vmem>>, vector<32x8xbf16>
    %cst = arith.constant dense<0.000000e+00> : vector<32x256xf32>
    %4 = tpu.matmul %3, %2, %cst {dimension_numbers = #tpu.dot_dimension_numbers<[1], [0], [0], [1], [0, 0, 1, 1], [], []>} : vector<32x8xbf16>, vector<8x256xbf16>, vector<32x256xf32> -> vector<32x256xf32>
    %c0_4 = arith.constant 0 : index
    %c0_5 = arith.constant 0 : index
    %c0_6 = arith.constant 0 : index
    %5 = vector.load %arg3[%c0_4, %c0_5, %c0_6] : memref<1x32x1xf32, #tpu.memory_space<vmem>>, vector<1x32x1xf32>
    %6 = vector.shape_cast %5 : vector<1x32x1xf32> to vector<32x1xf32>
    %7 = vector.broadcast %6 : vector<32x1xf32> to vector<32x256xf32>
    %8 = arith.addf %4, %7 : vector<32x256xf32>
    %9 = arith.truncf %8 : vector<32x256xf32> to vector<32x256xbf16>
    %10 = arith.negf %9 : vector<32x256xbf16>
    %11 = math.exp %10 : vector<32x256xbf16>
    %cst_7 = arith.constant 1.000000e+00 : bf16
    %12 = vector.broadcast %cst_7 : bf16 to vector<32x256xbf16>
    %13 = arith.addf %12, %11 : vector<32x256xbf16>
    %14 = arith.divf %12, %13 : vector<32x256xbf16>
    %15 = arith.mulf %9, %14 : vector<32x256xbf16>
    %c0_8 = arith.constant 0 : index
    %c0_9 = arith.constant 0 : index
    %16 = vector.load %arg6[%c0_8, %c0_9] : memref<4x32xbf16, #tpu.memory_space<vmem>>, vector<4x32xbf16>
    %cst_10 = arith.constant dense<0.000000e+00> : vector<4x256xf32>
    %17 = tpu.matmul %16, %15, %cst_10 {dimension_numbers = #tpu.dot_dimension_numbers<[1], [0], [0], [1], [0, 0, 1, 1], [], []>} : vector<4x32xbf16>, vector<32x256xbf16>, vector<4x256xf32> -> vector<4x256xf32>
    %c0_11 = arith.constant 0 : index
    %c0_12 = arith.constant 0 : index
    %18 = vector.load %arg7[%c0_11, %c0_12] : memref<4x1xf32, #tpu.memory_space<vmem>>, vector<4x1xf32>
    %19 = vector.broadcast %18 : vector<4x1xf32> to vector<4x256xf32>
    %20 = arith.addf %17, %19 : vector<4x256xf32>
    %c0_13 = arith.constant 0 : index
    %c0_14 = arith.constant 0 : index
    %c0_15 = arith.constant 0 : index
    %21 = vector.load %arg4[%c0_13, %c0_14, %c0_15] : memref<1x4x256xf32, #tpu.memory_space<vmem>>, vector<1x4x256xf32>
    %22 = vector.shape_cast %21 : vector<1x4x256xf32> to vector<4x256xf32>
    %23 = arith.addf %20, %22 : vector<4x256xf32>
    %24 = arith.truncf %23 : vector<4x256xf32> to vector<4x256xbf16>
    %c0_16 = arith.constant 0 : index
    %c0_17 = arith.constant 0 : index
    %c0_18 = arith.constant 0 : index
    %25 = vector.load %arg8[%c0_16, %c0_17, %c0_18] : memref<1x4x256xbf16, #tpu.memory_space<vmem>>, vector<1x4x256xbf16>
    %26 = vector.shape_cast %25 : vector<1x4x256xbf16> to vector<4x256xbf16>
    %27 = vector.shape_cast %24 : vector<4x256xbf16> to vector<1x4x256xbf16>
    tpu.vector_store %arg8[%c0_16, %c0_17, %c0_18], %27 {strides = array<i32>} : memref<1x4x256xbf16, #tpu.memory_space<vmem>>, vector<1x4x256xbf16>,
    return
  }
  func.func @transform_0(%arg0: i32, %arg1: i32) -> (i32, i32, i32) {
    %c0_i32 = arith.constant 0 : i32
    %c0_i32_0 = arith.constant 0 : i32
    return %arg0, %c0_i32, %arg1 : i32, i32, i32
  }
  func.func @transform_1(%arg0: i32, %arg1: i32) -> (i32, i32, i32) {
    %c0_i32 = arith.constant 0 : i32
    %c0_i32_0 = arith.constant 0 : i32
    %c0_i32_1 = arith.constant 0 : i32
    return %arg0, %c0_i32, %c0_i32_0 : i32, i32, i32
  }
  func.func @transform_2(%arg0: i32, %arg1: i32) -> (i32, i32, i32) {
    %c0_i32 = arith.constant 0 : i32
    %c0_i32_0 = arith.constant 0 : i32
    return %arg0, %c0_i32, %arg1 : i32, i32, i32
  }
  func.func @transform_3(%arg0: i32, %arg1: i32) -> (i32, i32) {
    %c0_i32 = arith.constant 0 : i32
    %c0_i32_0 = arith.constant 0 : i32
    %c0_i32_1 = arith.constant 0 : i32
    return %c0_i32, %c0_i32_0 : i32, i32
  }
  func.func @transform_4(%arg0: i32, %arg1: i32) -> (i32, i32) {
    %c0_i32 = arith.constant 0 : i32
    %c0_i32_0 = arith.constant 0 : i32
    %c0_i32_1 = arith.constant 0 : i32
    return %c0_i32, %c0_i32_0 : i32, i32
  }
  func.func @transform_5(%arg0: i32, %arg1: i32) -> (i32, i32) {
    %c0_i32 = arith.constant 0 : i32
    %c0_i32_0 = arith.constant 0 : i32
    %c0_i32_1 = arith.constant 0 : i32
    return %c0_i32, %c0_i32_0 : i32, i32
  }
  func.func @transform_6(%arg0: i32, %arg1: i32) -> (i32, i32, i32) {
    %c0_i32 = arith.constant 0 : i32
    %c0_i32_0 = arith.constant 0 : i32
    return %arg0, %c0_i32, %arg1 : i32, i32, i32
  }
}

</mosaic_0001>

<bundles_post_ra>
// kernel: tpu_custom_call.1
= control target key start
LH: loop header
LB: loop body
LE: loop exit
PB: predicated region body
PF: predicated region fallthrough
CT: control target
= control target key end

     0   :  { %11 = vsyncpa [#allocation3], 0  ;;  %s1026_s0 = inlined_call_operand.vmem [shape: f32[2,8,256], index: 0, kind: input, shape index: {}]   ;;  %s1027_s1 = inlined_call_operand.vmem [shape: f32[2,32,1], index: 1, kind: input, shape index: {}]   ;;  %s1028_s2 = inlined_call_operand.vmem [shape: f32[2,4,256], index: 2, kind: input, shape index: {}]   ;;  %s1029_s3 = inlined_call_operand.vmem [shape: bf16[32,8], index: 3, kind: input, shape index: {}]   ;;  %s1030_s4 = inlined_call_operand.vmem [shape: bf16[4,32], index: 4, kind: input, shape index: {}]   ;;  %s1031_s5 = inlined_call_operand.vmem [shape: f32[4,1], index: 5, kind: input, shape index: {}]   ;;  %s1032_s6 = inlined_call_operand.hbm [shape: bf16[2,4,256], index: 6, kind: output, shape index: {}]  }
   0x1   :  { %13 = vsyncpa [#allocation3 + $0x1], 0  ;;  %s904_s21 = smov 0   ;;  %s906_s22 = smov 0  }
   0x2   :  { %s908_s23 = smov 0   ;;  %s910_s24 = smov 0  }
   0x3   :  { %s912_s25 = smov 0   ;;  %s914_s26 = smov 0  }
   0x4 LB: > { %s679_s27 = sadd.s32 4294967295, %s865_s26   ;;  %s680_s28 = sadd.s32 4294967294, %s865_s26   ;;  %s865_s26 = sphi %s914_s26, %s19_s26   ;;  %s861_s25 = sphi %s912_s25, %s1039_s25   ;;  %s857_s24 = sphi %s910_s24, %s1038_s24   ;;  %s853_s23 = sphi %s908_s23, %s1037_s23   ;;  %s849_s22 = sphi %s906_s22, %s1036_s22   ;;  %s845_s21 = sphi %s904_s21, %s1035_s21  }
   0x5   : > { %s31_s29 = sadd.s32 1, %s861_s25  ;;  %s185_s30 = sadd.s32 1, %s853_s23 }
   0x6   : > { %p33_p0 = scmp.ge.s32.totalorder %s31_s29, 2  ;;  %p195_p1 = scmp.ne.s32.totalorder %s853_s23, %s849_s22 }
   0x7   : > { %p196_p2 = scmp.eq.s32.totalorder %s679_s27, 1  ;;  %p201_p3 = scmp.ne.s32.totalorder %s849_s22, %s845_s21 }
   0x8   : > { %s1041_s29 = smov (%p33_p0, %s31_s29), 0  ;;  %p202_p5 = scmp.eq.s32.totalorder %s680_s28, 1 }
   0x9   : > { %p944_p4 = por %p196_p2, %p195_p1  ;;  %s180_s8 = ssub.s32 %s861_s25, %s1041_s29 }
   0xa   : > { %p683_p6 = scmp.ge.s32.totalorder %s865_s26, 1  ;;  %p183_p7 = scmp.eq.s32.totalorder %s180_s8, 0 }
   0xb   : > { %p951_p8 = por %p202_p5, %p201_p3  ;;  %p263_p9 = scmp.lt.s32.totalorder %s865_s26, 3 }
   0xc   : > { %s957_s10 = scalar_select %p183_p7, %s853_s23, %s185_s30  }
   0xd   : > { %p264_p10 = pnand %p683_p6, %p263_p9 }
   0xe   : > { %p312_p11 = scmp.lt.s32.totalorder (!%p264_p10), %s857_s24, 1  ;;  %s711_s27 = sshll.u32 (!%p264_p10), %s857_s24, 6 }
   0xf   : > { %267 = sbr.rel (%p264_p10) target bundleno = 502 (0x1f6), region = 44 }
  0x14   : > { %v867_v0 = vmov 0   ;;  %s961_s11 = scalar_select %p312_p11, %s857_s24, 1  ;;  %vm388_vm0 = vcmask 1043456   ;;  %v770_v9 = vld [vmem:[%s1029_s3] sm:$0xff]   ;;  %vm381_vm1 = vcmask 64512   ;;  %v771_v12 = vld [vmem:[%s1029_s3 + $0x8] sm:$0xff]  }
  0x15   : > { %427 = vmatprep.mubr.bf16.mxu0 %v867_v0  ;;  %769 = vset.pattern.permute.xlu1 %v867_v0  ;;  %v485_v11 = vld [vmem:[%s1031_s5] sm:$0xf]  ;;  %vm491_vm2 = vcmask 261120  }
  0x16   : > { %768 = vset.pattern.permute.xlu0 %v867_v0  ;;  %527 = vmatprep.mubr.bf16.mxu1 %v867_v0  ;;  %s708_s12 = sshll.u32 %s961_s11, 4  ;;  %s709_s13 = sshll.u32 %s961_s11, 5  ;;  %v484_v61 = vld [vmem:[%s1030_s4] sm:$0x3] }
  0x17   : > { %s319_s16 = scalar_lea.vmem %s1026_s0, %s708_s12  ;;  %s325_s19 = scalar_lea.vmem %s1027_s1, %s709_s13 }
  0x18   : > { %v340_v1 = vld [vmem:[%s319_s16 + $0x8] sm:$0xff]  ;;  %v339_v2 = vld [vmem:[%s319_s16] sm:$0xff]  ;;  %v349_v6 = vld [vmem:[%s325_s19 + $0x10] sm:$0xff]  ;;  %s710_s15 = sshll.u32 %s961_s11, 3  ;;  %s571_s12 = scalar_lea.hbm %s1032_s6, %s711_s27 }
  0x19   : > { %v347_v3 = vld [vmem:[%s325_s19] sm:$0xff]  ;;  %v342_v4 = vpack.c.bf16 %v340_v1, %v340_v1  ;;  %v341_v5 = vpack.c.bf16 %v339_v2, %v339_v2  ;;  %363 = vperm.xlu0 %768, %v349_v6   ;;  %v348_v7 = vld [vmem:[%s325_s19 + $0x8] sm:$0xff]  ;;  %v350_v10 = vld [vmem:[%s325_s19 + $0x18] sm:$0xff]  ;;  %s334_s18 = scalar_lea.vmem %s1028_s2, %s710_s15  ;;  %s308_s19 = sand.u32 1, %s849_s22  }
  0x1a   : > { %353 = vperm.xlu1 %769, %v347_v3   ;;  %v536_v62 = vld [vmem:[%s334_s18] sm:$0xff]  ;;  %s684_s20 = sshll.u32 %s308_s19, 2  ;;  %s557_s13 = scalar_lea.sflag [#allocation3], %s308_s19 }
  0x1b   : > { %693 = vmatprep.subr.msk.bf16.mxu0 %vm388_vm0, %v342_v4  ;;  %v390_v8 = vsel %vm388_vm0, %v341_v5, 0  ;;  %v538_v2 = vcombine.high %v536_v62, %v536_v62  ;;  %s310_s28 = scalar_lea.vmem [#allocation2], %s684_s20  ;;  %s868_s15 = smov [#allocation2]  }
  0x1c   : > { %410 = vmatpush1.bf16.msra.mxu0 %v390_v8  ;;  %s573_s30 = sshll.u32 %s310_s28, 4  ;;  %s793_s24 = sshll.u32 %s868_s15, 4  ;;  %s574_s30 = int_to_ptr.vmem [resolvable:$true] %s573_s30  ;;  %s794_s24 = int_to_ptr.vmem [resolvable:$false] %s793_s24 }
  0x1d   : > { %368 = vperm.xlu0 %768, %v350_v10   ;;  %s789_s14 = scalar_lea.vmem %s574_s30, 64  ;;  %s795_s16 = scalar_lea.vmem %s794_s24, 128 }
  0x1e   : > { %358 = vperm.xlu1 %769, %v348_v7   ;;  %p790_p12 = scmp.ne.s32.totalorder %s574_s30, %s789_s14  ;;  %p796_p1 = scmp.lt.s32.totalorder %s574_s30, %s794_s24 }
  0x1f   : > { %694 = vmatmul.mubr.msk.bf16.vlgmr.msra.gmra.mxu0 %vm381_vm1, %v770_v9  ;;  %p797_p2 = scmp.lt.s32.totalorder %s795_s16, %s789_s14 }
  0x20   : > { %437 = vmatprep.mubr.bf16.mxu0 %v867_v0  ;;  %p791_p13 = pnand %p790_p12, %p944_p4 }
  0x21   : > { %488 = vperm.xlu0 %768, %v485_v11   ;;  %p798_p3 = por %p797_p2, %p796_p1 }
  0x22   : > { %p792_p0 = pneg %p791_p13 }
  0x24   : > { %p799_p5 = pnand %p798_p3, %p792_p0 }
  0x27   : > { %695 = vmatmul.mubr.msk.bf16.gmra.mxu0 %vm381_vm1, %v771_v12 }
  0x94   : > { %v364_v18 = vpop.permute.xlu0 %363 }
  0x95   : > { %v354_v13 = vpop.permute.xlu1 %353 }
  0x98   : > { %v369_v29 = vpop.permute.xlu0 %368 }
  0x99   : > { %v359_v16 = vpop.permute.xlu1 %358 }
  0x9c   : > { %v489_v63 = vpop.permute.xlu0 %488 }
  0xdf   : > { %v429_v14 = vpop.f32.mrf.mxu0 }
  0xe0   : > { %v430_v23 = vadd.f32 %v429_v14, %v354_v13 }
  0xe1   : > { %v431_v15 = vpop.f32.mrf.mxu0 }
  0xe2   : > { %v432_v21 = vadd.f32 %v431_v15, %v354_v13 }
  0xe3   : > { %v433_v17 = vpop.f32.mrf.mxu0 }
  0xe4   : > { %v434_v19 = vadd.f32 %v433_v17, %v359_v16 }
  0xe5   : > { %v435_v20 = vpop.f32.mrf.mxu0 }
  0xe6   : > { %v436_v22 = vadd.f32 %v435_v20, %v359_v16  ;;  %v448_v26 = vpack.c.bf16 %v434_v19, %v430_v23 }
  0xe7   : > { %v439_v24 = vpop.f32.mrf.mxu0 }
  0xe8   : > { %v449_v25 = vpack.c.bf16 %v436_v22, %v432_v21  ;;  %v440_v31 = vadd.f32 %v439_v24, %v364_v18  ;;  %v696_v33 = vmul.bf16 3216621497, %v448_v26 }
  0xe9   : > { %v441_v27 = vpop.f32.mrf.mxu0 }
  0xea   : > { %v697_v28 = vmul.bf16 3216621497, %v449_v25  ;;  %v442_v35 = vadd.f32 %v441_v27, %v364_v18 }
  0xeb   : > { %v443_v30 = vpop.f32.mrf.mxu0 }
  0xec   : > { %v444_v32 = vadd.f32 %v443_v30, %v369_v29  ;;  %773 = vpow.bf16 %v697_v28 }
  0xed   : > { %v445_v34 = vpop.f32.mrf.mxu0  ;;  %775 = vpow.bf16 %v696_v33 }
  0xee   : > { %v450_v36 = vpack.c.bf16 %v444_v32, %v440_v31  ;;  %v446_v37 = vadd.f32 %v445_v34, %v369_v29 }
  0xf0   : > { %v698_v38 = vmul.bf16 3216621497, %v450_v36  ;;  %v451_v39 = vpack.c.bf16 %v446_v37, %v442_v35 }
  0xf2   : > { %777 = vpow.bf16 %v698_v38  ;;  %v699_v40 = vmul.bf16 3216621497, %v451_v39 }
  0xf4   : > { %779 = vpow.bf16 %v699_v40 }
  0xfa   : > { %v774_v41 = vpop.eup %773 }
  0xfb   : > { %v469_v42 = vadd.bf16 1065369472, %v774_v41  ;;  %v776_v43 = vpop.eup %775 }
  0xfc   : > { %v468_v47 = vadd.bf16 1065369472, %v776_v43 }
  0xfd   : > { %781 = vrcp.bf16 %v469_v42 }
 0x100   : > { %v778_v44 = vpop.eup %777 }
 0x101   : > { %v470_v45 = vadd.bf16 1065369472, %v778_v44 }
 0x102   : > { %v780_v46 = vpop.eup %779 }
 0x103   : > { %v471_v48 = vadd.bf16 1065369472, %v780_v46  ;;  %783 = vrcp.bf16 %v470_v45 }
 0x105   : > { %785 = vrcp.bf16 %v471_v48 }
 0x106   : > { %787 = vrcp.bf16 %v468_v47 }
 0x10b   : > { %v782_v49 = vpop.eup %781 }
 0x10c   : > { %v475_v55 = vmul.bf16 1065369472, %v782_v49 }
 0x10e   : > { %v481_v59 = vmul.bf16 %v475_v55, %v449_v25 }
 0x111   : > { %v784_v50 = vpop.eup %783 }
 0x112   : > { %v477_v52 = vmul.bf16 1065369472, %v784_v50 }
 0x113   : > { %v786_v51 = vpop.eup %785 }
 0x114   : > { %v788_v53 = vpop.eup %787  ;;  %v479_v54 = vmul.bf16 1065369472, %v786_v51  ;;  %v482_v57 = vmul.bf16 %v477_v52, %v450_v36 }
 0x115   : > { %v473_v58 = vmul.bf16 1065369472, %v788_v53 }
 0x116   : > { %v483_v56 = vmul.bf16 %v479_v54, %v451_v39 }
 0x117   : > { %v480_v60 = vmul.bf16 %v473_v58, %v448_v26 }
 0x118   : > { %507 = vmatprep.subr.bf16.mxu1 %v483_v56 }
 0x119   : > { %508 = vmatpush1.bf16.msra.mxu1 %v482_v57 }
 0x11a   : > { %509 = vmatprep.subr.bf16.mxu1 %v481_v59 }
 0x11d   : > { %510 = vmatpush1.bf16.msra.mxu1 %v480_v60 }
 0x120   : > { %700 = vmatmul.mubr.msk.bf16.vlgmr.msra.gmra.mxu1 %vm491_vm2, %v484_v61 }
 0x1e0   : > { %v529_v0 = vpop.f32.mrf.mxu1 }
 0x1e1   : > { %v530_v1 = vadd.f32 %v529_v0, %v489_v63 }
 0x1e2   : > { %v531_v3 = vpop.f32.mrf.mxu1 }
 0x1e3   : > { %v532_v4 = vadd.f32 %v531_v3, %v489_v63  ;;  %v540_v6 = vadd.f32 %v536_v62, %v530_v1 }
 0x1e4   : > { %v533_v5 = vpop.f32.mrf.mxu1 }
 0x1e5   : > { %v541_v7 = vadd.f32 %v538_v2, %v532_v4 }
 0x1e6   : > { %v534_v8 = vpop.f32.mrf.mxu1 }
 0x1e7   : > { %v701_v9 = vpack.c.bf16 %v541_v7, %v540_v6 }
 0x1e9   : > { %702 = vst.sshfl [vmem:[%s310_s28] sm:$0x33 pattern:$0x76325410] %v701_v9 }
 0x1ea   : > { %802 = shalt.err (!%p799_p5)
}
 0x1eb   : > { %s803_s17 = scalar_lea.hbm %s571_s12, 64  ;;  %s807_s20 = scalar_lea.hbm %s1032_s6, 128 }
 0x1ec   : > { %p804_p6 = scmp.ne.s32.totalorder %s571_s12, %s803_s17  ;;  %p808_p10 = scmp.lt.s32.totalorder %s571_s12, %s1032_s6 }
 0x1ed   : > { %p809_p11 = scmp.lt.s32.totalorder %s807_s20, %s803_s17 }
 0x1ee   : > { %p805_p7 = pnand %p804_p6, %p944_p4 }
 0x1ef   : > { %p810_p12 = por %p809_p11, %p808_p10 }
 0x1f0   : > { %p806_p9 = pneg %p805_p7 }
 0x1f2   : > { %p811_p13 = pnand %p810_p12, %p806_p9 }
 0x1f4   : > { %814 = shalt.err (!%p811_p13)
}
 0x1f5   : > { %712 = dma.vmem_to_hbm [thread:$0]  (%p944_p4), %s574_s30, 64, %s571_s12, %s557_s13  }
 0x1f6 PF: > { %p718_p0 = scmp.ge.s32.totalorder %s865_s26, 2  ;;  %s585_s11 = sand.u32 1, %s845_s21  }
 0x1f7   : > { %s586_s8 = scalar_lea.sflag [#allocation3], %s585_s11 }
 0x1f8   : > { %p715_p1 = pnand %p718_p0, %p951_p8 }
 0x1fa   : > { %p716_p2 = pneg %p715_p1 }
 0x1fc   : > { %840 = dma.done.wait (%p716_p2), %s586_s8, 64  }
 0x1fd   : > { %842 = vsyncadd (%p716_p2), %s586_s8, 4294967232  ;;  %s19_s26 = sadd.s32 1, %s865_s26   ;;  %s1035_s21 = smov %s849_s22 }
 0x1fe   : > { %p16_p3 = scmp.ge.s32.totalorder %s19_s26, 4   ;;  %s1036_s22 = smov %s853_s23 }
 0x1ff   : > { %s1037_s23 = smov %s957_s10  ;;  %s1038_s24 = smov %s861_s25 }
 0x200   : > { %s1039_s25 = smov %s1041_s29  ;;  %18 = sbr.rel (!%p16_p3) target bundleno = 4 (0x4), region = 85 }
 0x205   :  { %591 = vsyncpa [#allocation3], 1 }
 0x206   :  { %593 = vsyncpa [#allocation3 + $0x1], 1 }

</bundles_post_ra>
